<compile_context>
chip_gen: v7x
topology: tpu7x:2x2x1
jax: 0.10.0
libtpu: 0.0.40
codegen_flags: <defaults>
</compile_context>

<pallas_src>
import functools

import jax
import jax.numpy as jnp
from jax.experimental import pallas as pl
from jax.experimental.pallas import tpu as pltpu


def _round_up(x, m):
    return (x + m - 1) // m * m


# ----------------------------- fused Pallas kernel ---------------------------
def _simmim_fused_kernel(patches_ref, mask_ref, pw_ref, pb_ref, mtok_ref,
                         dw_ref, db_ref, part_ref):
    x_in = patches_ref[...]                      # (tm, Kp) fp32 (or bf16 if streamed)
    x32 = x_in.astype(jnp.float32)

    # encoder stand-in: patch-embed matmul (bf16 MXU operands, fp32 accumulation)
    z = jnp.dot(x_in.astype(jnp.bfloat16), pw_ref[...],
                preferred_element_type=jnp.float32) + pb_ref[...]      # (tm, Dp)

    # mask-token replacement (fp32 VPU math)
    m = mask_ref[...]                                                  # (tm, 1)
    z = z * (1.0 - m) + mtok_ref[...] * m

    # decoder Conv2d(D, s*s*3, kernel_size=1) == matmul (bf16 MXU, fp32 accum)
    y = jnp.dot(z.astype(jnp.bfloat16), dw_ref[...],
                preferred_element_type=jnp.float32) + db_ref[...]      # (tm, N2p)

    # masked L1 partial numerator; token layout of y == PixelShuffle output layout,
    # padded columns are exact zeros on both sides, padded rows carry mask = 0.
    part = jnp.sum(jnp.abs(x32 - y) * m)
    part_ref[...] = jnp.broadcast_to(part.reshape(1, 1, 1), part_ref.shape)


# ----------------------------- tiling helpers ---------------------------------
def _pick_tm(m, cap):
    tm = min(cap, _round_up(m, 8))
    tm -= tm % 8
    tm = max(tm, 8)
    # keep >= 2 grid blocks so the "parallel" token axis can use both v7x cores
    if m > 8 and (m + tm - 1) // tm < 2:
        tm = max(8, _round_up((m + 1) // 2, 8))
    return tm


def _vmem_limit_bytes(tm, Kp, Dp, N2p, patch_itemsize):
    resident = Kp * Dp * 2 + Dp * N2p * 2 + (2 * Dp + N2p) * 4     # single-copy weights
    streamed = 2 * (tm * Kp * patch_itemsize + tm * 128 * 4)       # double-buffered inputs
    out = 2 * 128 * 4
    live = 2 * tm * (Kp + Dp + N2p) * 4                            # x32 / z / y values
    total = resident + streamed + out + live
    # floor at the default 32 MiB, cap at 64 MiB so the request also fits v7x.
    return int(min(max(total * 3 // 2, 32 * 1024 * 1024), 64 * 1024 * 1024))


# ----------------------------- parameters ------------------------------------
def init_params(key, in_chans, encoder_stride, final_dim):
    s = encoder_stride
    k1, k2, k3 = jax.random.split(key, 3)
    return dict(
        # encoder stand-in: patch-embed conv (kernel = stride = s) as a matmul
        patch_w=0.02 * jax.random.normal(k1, (in_chans * s * s, final_dim), jnp.float32),
        patch_b=jnp.zeros((final_dim,), jnp.float32),
        mask_token=0.02 * jax.random.normal(k2, (final_dim,), jnp.float32),
        # decoder: Conv2d(final_dim, s*s*3, kernel_size=1) as a matmul
        dec_w=0.02 * jax.random.normal(k3, (final_dim, s * s * 3), jnp.float32),
        dec_b=jnp.zeros((s * s * 3,), jnp.float32),
    )


def prepare_params(params, *, in_chans, encoder_stride):
    """One-time lane-dense (multiple-of-128) zero-pad + bf16 cast of the weights.

    Hoisted out of the forward so the cast/pad HBM traffic is paid once per
    weight update instead of on every forward call. All padding is exact zeros.
    """
    s = encoder_stride
    K = in_chans * s * s
    N2 = 3 * s * s
    D = params["patch_w"].shape[1]
    Kp, N2p, Dp = _round_up(K, 128), _round_up(N2, 128), _round_up(D, 128)
    return dict(
        patch_w=jnp.pad(params["patch_w"], ((0, Kp - K), (0, Dp - D))).astype(jnp.bfloat16),
        patch_b=jnp.pad(params["patch_b"], (0, Dp - D)).reshape(1, Dp).astype(jnp.float32),
        mask_token=jnp.pad(params["mask_token"], (0, Dp - D)).reshape(1, Dp).astype(jnp.float32),
        dec_w=jnp.pad(params["dec_w"], ((0, Dp - D), (0, N2p - N2))).astype(jnp.bfloat16),
        dec_b=jnp.pad(params["dec_b"], (0, N2p - N2)).reshape(1, N2p).astype(jnp.float32),
    )


# ----------------------------- forward ----------------------------------------
def simmim_forward(prepared, x, mask, *, in_chans, encoder_stride, patch_size,
                   block_tokens=256, patches_bf16=False):
    B, C, H, W = x.shape
    s = encoder_stride
    assert C == 3 and in_chans == 3, "decoder reconstructs 3 channels"
    # TODO(synk): real SimMIM injects a Swin encoder; this stand-in (patch-embed +
    # mask-token blend) assumes the mask grid matches the encoder token grid.
    assert patch_size == s
    Hp, Wp = H // s, W // s
    M = B * Hp * Wp
    K = C * s * s
    Kp, Dp = prepared["patch_w"].shape
    N2p = prepared["dec_w"].shape[1]
    assert Kp == N2p  # both sides of the L1 compare share the padded 3*s*s width

    tm = _pick_tm(M, block_tokens)
    G = (M + tm - 1) // tm
    Mp = G * tm  # padded-tail token count (pad rows carry mask = 0 -> contribute 0)

    # token-layout patches, (c, i, j) ordering == PixelShuffle channel ordering.
    # TODO(synk): relies on allow_input_fusion to fold this transpose/pad into the
    # kernel's input DMA; an in-kernel patchify over NCHW x would remove it for sure.
    patches = x.reshape(B, C, Hp, s, Wp, s).transpose(0, 2, 4, 1, 3, 5).reshape(M, K)
    patches = jnp.pad(patches, ((0, Mp - M), (0, Kp - K)))
    patches = patches.astype(jnp.bfloat16 if patches_bf16 else jnp.float32)
    mask_tok = jnp.pad(mask.reshape(M, 1).astype(jnp.float32), ((0, Mp - M), (0, 0)))

    flops = 2 * Mp * (Kp * Dp + Dp * N2p)
    bytes_accessed = (Mp * Kp * patches.dtype.itemsize + Mp * 4
                      + Kp * Dp * 2 + Dp * N2p * 2 + (2 * Dp + N2p) * 4
                      + G * 128 * 4)

    resident_spec = pl.BlockSpec(memory_space=pltpu.MemorySpace.VMEM)  # single VMEM copy

    partials = pl.pallas_call(
        _simmim_fused_kernel,
        out_shape=jax.ShapeDtypeStruct((G, 1, 128), jnp.float32),
        grid=(G,),
        in_specs=[
            pl.BlockSpec((tm, Kp), lambda i: (i, 0)),   # patches (streamed, pipelined)
            pl.BlockSpec((tm, 1), lambda i: (i, 0)),    # per-token mask (streamed)
            resident_spec,                              # patch_w  (bf16, resident)
            resident_spec,                              # patch_b
            resident_spec,                              # mask_token
            resident_spec,                              # dec_w    (bf16, resident)
            resident_spec,                              # dec_b
        ],
        out_specs=pl.BlockSpec((1, 1, 128), lambda i: (i, 0, 0)),
        compiler_params=pltpu.CompilerParams(
            dimension_semantics=("parallel",),
            vmem_limit_bytes=_vmem_limit_bytes(tm, Kp, Dp, N2p,
                                               patches.dtype.itemsize),
            allow_input_fusion=[True, True, False, False, False, False, False],
        ),
        cost_estimate=pl.CostEstimate(
            flops=flops, transcendentals=0, bytes_accessed=bytes_accessed),
    )(patches, mask_tok, prepared["patch_w"], prepared["patch_b"],
      prepared["mask_token"], prepared["dec_w"], prepared["dec_b"])

    num = jnp.sum(partials[:, 0, 0])
    den = jnp.sum(mask.astype(jnp.float32)) * float(patch_size * patch_size)
    return num / (den + 1e-5) / in_chans


# ----------------------------- pure-JAX reference -----------------------------
# Mirrors the PyTorch module (full NCHW PixelShuffle + repeat_interleave mask path)
# with the same bf16-operand / fp32-accumulation matmul precision as the kernel.
def reference_forward(params, x, mask, *, in_chans, encoder_stride, patch_size):
    B, C, H, W = x.shape
    s = encoder_stride
    Hp, Wp = H // s, W // s
    patches = x.reshape(B, C, Hp, s, Wp, s).transpose(0, 2, 4, 1, 3, 5)
    patches = patches.reshape(B * Hp * Wp, C * s * s)
    z = jnp.dot(patches.astype(jnp.bfloat16), params["patch_w"].astype(jnp.bfloat16),
                preferred_element_type=jnp.float32) + params["patch_b"]
    m_tok = mask.reshape(B * Hp * Wp, 1).astype(jnp.float32)
    z = z * (1.0 - m_tok) + params["mask_token"][None, :] * m_tok
    y = jnp.dot(z.astype(jnp.bfloat16), params["dec_w"].astype(jnp.bfloat16),
                preferred_element_type=jnp.float32) + params["dec_b"]
    x_rec = y.reshape(B, Hp, Wp, 3, s, s).transpose(0, 3, 1, 4, 2, 5).reshape(B, 3, H, W)
    mask_full = jnp.repeat(jnp.repeat(mask, patch_size, axis=1), patch_size, axis=2)
    mask_full = mask_full[:, None, :, :].astype(jnp.float32)
    loss_recon = jnp.abs(x - x_rec)
    return (loss_recon * mask_full).sum() / (mask_full.sum() + 1e-5) / in_chans


if __name__ == "__main__":
    B, C, H, W = 2, 3, 16, 16
    encoder_stride = 4
    patch_size = 4
    final_dim = 32

    key = jax.random.PRNGKey(0)
    kx, km, kp = jax.random.split(key, 3)
    x = jax.random.normal(kx, (B, C, H, W), jnp.float32)
    mask = (jax.random.uniform(km, (B, H // patch_size, W // patch_size)) > 0.5
            ).astype(jnp.float32)
    params = init_params(kp, C, encoder_stride, final_dim)
    prepared = prepare_params(params, in_chans=C, encoder_stride=encoder_stride)

    # 32 tokens, block_tokens=8 -> grid=(4,): exercises the tiled / pipelined path.
    fwd = jax.jit(functools.partial(
        simmim_forward, in_chans=C, encoder_stride=encoder_stride,
        patch_size=patch_size, block_tokens=8))

    loss = jax.block_until_ready(fwd(prepared, x, mask))

    ref = reference_forward(params, x, mask, in_chans=C,
                            encoder_stride=encoder_stride, patch_size=patch_size)
    assert jnp.allclose(loss, ref, rtol=1e-3, atol=1e-6), (float(loss), float(ref))
    print("KERNEL_OK")
</pallas_src>

<mosaic_0001>
module attributes {stable_mosaic.version = 11 : i64} {
  func.func @_simmim_fused_kernel(%arg0: i32, %arg1: memref<8x128xf32, #tpu.memory_space<vmem>>, %arg2: memref<8x1xf32, #tpu.memory_space<vmem>>, %arg3: memref<128x128xbf16, #tpu.memory_space<vmem>>, %arg4: memref<1x128xf32, #tpu.memory_space<vmem>>, %arg5: memref<1x128xf32, #tpu.memory_space<vmem>>, %arg6: memref<128x128xbf16, #tpu.memory_space<vmem>>, %arg7: memref<1x128xf32, #tpu.memory_space<vmem>>, %arg8: memref<1x1x128xf32, #tpu.memory_space<vmem>>) attributes {dimension_semantics = [#tpu.dimension_semantics<parallel>], iteration_bounds = array<i64: 4>, scalar_prefetch = 0 : i64, scratch_operands = 0 : i64, tpu.core_type = #tpu.core_type<tc>, window_params = [{transform_indices = @transform_0, window_bounds = array<i64: 8, 128>}, {transform_indices = @transform_1, window_bounds = array<i64: 8, 1>}, {pipeline_mode = #tpu.pipeline_mode<synchronous>, transform_indices = @transform_2, window_bounds = array<i64: 128, 128>}, {pipeline_mode = #tpu.pipeline_mode<synchronous>, transform_indices = @transform_3, window_bounds = array<i64: 1, 128>}, {pipeline_mode = #tpu.pipeline_mode<synchronous>, transform_indices = @transform_4, window_bounds = array<i64: 1, 128>}, {pipeline_mode = #tpu.pipeline_mode<synchronous>, transform_indices = @transform_5, window_bounds = array<i64: 128, 128>}, {pipeline_mode = #tpu.pipeline_mode<synchronous>, transform_indices = @transform_6, window_bounds = array<i64: 1, 128>}, {transform_indices = @transform_7, window_bounds = array<i64: 1, 1, 128>}]} {
    %c0 = arith.constant 0 : index
    %c0_0 = arith.constant 0 : index
    %0 = vector.load %arg1[%c0, %c0_0] : memref<8x128xf32, #tpu.memory_space<vmem>>, vector<8x128xf32>
    %1 = arith.truncf %0 : vector<8x128xf32> to vector<8x128xbf16>
    %c0_1 = arith.constant 0 : index
    %c0_2 = arith.constant 0 : index
    %2 = vector.load %arg3[%c0_1, %c0_2] : memref<128x128xbf16, #tpu.memory_space<vmem>>, vector<128x128xbf16>
    %cst = arith.constant dense<0.000000e+00> : vector<8x128xf32>
    %3 = tpu.matmul %1, %2, %cst {dimension_numbers = #tpu.dot_dimension_numbers<[1], [0], [0], [1], [0, 0, 1, 1], [], []>} : vector<8x128xbf16>, vector<128x128xbf16>, vector<8x128xf32> -> vector<8x128xf32>
    %c0_3 = arith.constant 0 : index
    %c0_4 = arith.constant 0 : index
    %4 = vector.load %arg4[%c0_3, %c0_4] : memref<1x128xf32, #tpu.memory_space<vmem>>, vector<1x128xf32>
    %5 = vector.broadcast %4 : vector<1x128xf32> to vector<8x128xf32>
    %6 = arith.addf %3, %5 : vector<8x128xf32>
    %c0_5 = arith.constant 0 : index
    %c0_6 = arith.constant 0 : index
    %7 = vector.load %arg2[%c0_5, %c0_6] : memref<8x1xf32, #tpu.memory_space<vmem>>, vector<8x1xf32>
    %cst_7 = arith.constant 1.000000e+00 : f32
    %8 = vector.broadcast %cst_7 : f32 to vector<8x1xf32>
    %9 = arith.subf %8, %7 : vector<8x1xf32>
    %10 = vector.broadcast %9 : vector<8x1xf32> to vector<8x128xf32>
    %11 = arith.mulf %6, %10 : vector<8x128xf32>
    %c0_8 = arith.constant 0 : index
    %c0_9 = arith.constant 0 : index
    %12 = vector.load %arg5[%c0_8, %c0_9] : memref<1x128xf32, #tpu.memory_space<vmem>>, vector<1x128xf32>
    %13 = vector.broadcast %12 : vector<1x128xf32> to vector<8x128xf32>
    %14 = vector.broadcast %7 : vector<8x1xf32> to vector<8x128xf32>
    %15 = arith.mulf %13, %14 : vector<8x128xf32>
    %16 = arith.addf %11, %15 : vector<8x128xf32>
    %17 = arith.truncf %16 : vector<8x128xf32> to vector<8x128xbf16>
    %c0_10 = arith.constant 0 : index
    %c0_11 = arith.constant 0 : index
    %18 = vector.load %arg6[%c0_10, %c0_11] : memref<128x128xbf16, #tpu.memory_space<vmem>>, vector<128x128xbf16>
    %cst_12 = arith.constant dense<0.000000e+00> : vector<8x128xf32>
    %19 = tpu.matmul %17, %18, %cst_12 {dimension_numbers = #tpu.dot_dimension_numbers<[1], [0], [0], [1], [0, 0, 1, 1], [], []>} : vector<8x128xbf16>, vector<128x128xbf16>, vector<8x128xf32> -> vector<8x128xf32>
    %c0_13 = arith.constant 0 : index
    %c0_14 = arith.constant 0 : index
    %20 = vector.load %arg7[%c0_13, %c0_14] : memref<1x128xf32, #tpu.memory_space<vmem>>, vector<1x128xf32>
    %21 = vector.broadcast %20 : vector<1x128xf32> to vector<8x128xf32>
    %22 = arith.addf %19, %21 : vector<8x128xf32>
    %23 = arith.subf %0, %22 : vector<8x128xf32>
    %24 = math.absf %23 : vector<8x128xf32>
    %25 = vector.broadcast %7 : vector<8x1xf32> to vector<8x128xf32>
    %26 = arith.mulf %24, %25 : vector<8x128xf32>
    %27 = vector.shape_cast %26 : vector<8x128xf32> to vector<1x8x128xf32>
    %cst_15 = arith.constant dense<0.000000e+00> : vector<1xf32>
    %28 = vector.multi_reduction <add>, %27, %cst_15 [1, 2] : vector<1x8x128xf32> to vector<1xf32>
    %29 = vector.shape_cast %28 : vector<1xf32> to vector<1x1x1xf32>
    %30 = vector.extract %29[0, 0, 0] : f32 from vector<1x1x1xf32>
    %31 = vector.broadcast %30 : f32 to vector<1x1x1xf32>
    %32 = vector.shape_cast %31 : vector<1x1x1xf32> to vector<1x1x1xf32>
    %33 = vector.broadcast %32 : vector<1x1x1xf32> to vector<1x1x128xf32>
    %c0_16 = arith.constant 0 : index
    %c0_17 = arith.constant 0 : index
    %c0_18 = arith.constant 0 : index
    %34 = vector.load %arg8[%c0_16, %c0_17, %c0_18] : memref<1x1x128xf32, #tpu.memory_space<vmem>>, vector<1x1x128xf32>
    tpu.vector_store %arg8[%c0_16, %c0_17, %c0_18], %33 {strides = array<i32>} : memref<1x1x128xf32, #tpu.memory_space<vmem>>, vector<1x1x128xf32>,
    return
  }
  func.func @transform_0(%arg0: i32) -> (i32, i32) {
    %c0_i32 = arith.constant 0 : i32
    %c0_i32_0 = arith.constant 0 : i32
    return %arg0, %c0_i32 : i32, i32
  }
  func.func @transform_1(%arg0: i32) -> (i32, i32) {
    %c0_i32 = arith.constant 0 : i32
    %c0_i32_0 = arith.constant 0 : i32
    return %arg0, %c0_i32 : i32, i32
  }
  func.func @transform_2(%arg0: i32) -> (i32, i32) {
    %c0_i32 = arith.constant 0 : i32
    %c0_i32_0 = arith.constant 0 : i32
    %c0_i32_1 = arith.constant 0 : i32
    return %c0_i32, %c0_i32_0 : i32, i32
  }
  func.func @transform_3(%arg0: i32) -> (i32, i32) {
    %c0_i32 = arith.constant 0 : i32
    %c0_i32_0 = arith.constant 0 : i32
    %c0_i32_1 = arith.constant 0 : i32
    return %c0_i32, %c0_i32_0 : i32, i32
  }
  func.func @transform_4(%arg0: i32) -> (i32, i32) {
    %c0_i32 = arith.constant 0 : i32
    %c0_i32_0 = arith.constant 0 : i32
    %c0_i32_1 = arith.constant 0 : i32
    return %c0_i32, %c0_i32_0 : i32, i32
  }
  func.func @transform_5(%arg0: i32) -> (i32, i32) {
    %c0_i32 = arith.constant 0 : i32
    %c0_i32_0 = arith.constant 0 : i32
    %c0_i32_1 = arith.constant 0 : i32
    return %c0_i32, %c0_i32_0 : i32, i32
  }
  func.func @transform_6(%arg0: i32) -> (i32, i32) {
    %c0_i32 = arith.constant 0 : i32
    %c0_i32_0 = arith.constant 0 : i32
    %c0_i32_1 = arith.constant 0 : i32
    return %c0_i32, %c0_i32_0 : i32, i32
  }
  func.func @transform_7(%arg0: i32) -> (i32, i32, i32) {
    %c0_i32 = arith.constant 0 : i32
    %c0_i32_0 = arith.constant 0 : i32
    %c0_i32_1 = arith.constant 0 : i32
    return %arg0, %c0_i32, %c0_i32_0 : i32, i32, i32
  }
}

</mosaic_0001>

<bundles_post_ra>
// kernel: simmim_forward.2
= control target key start
LH: loop header
LB: loop body
LE: loop exit
PB: predicated region body
PF: predicated region fallthrough
CT: control target
= control target key end

     0   :  { %s795_s29 = smov 0   ;;  %s898_s0 = inlined_call_operand.vmem [shape: f32[32,1], index: 0, kind: input, shape index: {}]   ;;  %s899_s1 = inlined_call_operand.vmem [shape: bf16[128,128], index: 1, kind: input, shape index: {}]   ;;  %s900_s2 = inlined_call_operand.vmem [shape: f32[1,128], index: 2, kind: input, shape index: {}]   ;;  %s901_s3 = inlined_call_operand.vmem [shape: f32[1,128], index: 3, kind: input, shape index: {}]   ;;  %s902_s4 = inlined_call_operand.vmem [shape: bf16[128,128], index: 4, kind: input, shape index: {}]   ;;  %s903_s5 = inlined_call_operand.vmem [shape: f32[1,128], index: 5, kind: input, shape index: {}]   ;;  %s904_s6 = inlined_call_operand.vmem [shape: f32[32,48], index: 6, kind: input, shape index: {}]   ;;  %s905_s7 = inlined_call_operand.<no memory space> [shape: f32[], index: 7, kind: input, shape index: {}]   ;;  %s906_s8 = inlined_call_operand.vmem [shape: f32[4,1,128], index: 8, kind: output, shape index: {}]  }
   0x1   :  { %v13_v0 = vstv %s905_s7 }
   0x2 LB: > { %s620_s30 = sadd.s32 4294967295, %s742_s29   ;;  %p624_p0 = scmp.ge.s32.totalorder %s742_s29, 1  ;;  %s742_s29 = sphi %s795_s29, %s19_s29  }
   0x3   : > { %p247_p1 = scmp.lt.s32.totalorder %s742_s29, 5 }
   0x5   : > { %p248_p2 = pnand %p624_p0, %p247_p1 }
   0x6   : > { %v720_v1 = vld [vmem:[%s899_s1] sm:$0xff] (!%p248_p2)   ;;  %v744_v2 = vmov (!%p248_p2), 0.0   ;;  %v721_v3 = vld [vmem:[%s899_s1 + $0x8] sm:$0xff] (!%p248_p2)   ;;  %vm745_vm0 = vmmov (!%p248_p2), 0   ;;  %p280_p3 = scmp.lt.s32.totalorder (!%p248_p2), %s620_s30, 3  ;;  %v722_v4 = vld [vmem:[%s899_s1 + $0x10] sm:$0xff] (!%p248_p2)   ;;  %v292_v12 = vlaneseq (!%p248_p2) }
   0x7   : > { %251 = sbr.rel (%p248_p2) target bundleno = 685 (0x2ad), region = 48  ;;  %666 = vmatprep.subr.bf16.mxu0 (!%p248_p2), %v744_v2  ;;  %686 = vmatprep.subr.bf16.mxu1 (!%p248_p2), %v744_v2  ;;  %v746_v5 = vmov (!%p248_p2), 0   ;;  %v728_v8 = vld [vmem:[%s902_s4] sm:$0xff] (!%p248_p2)   ;;  %v723_v9 = vld [vmem:[%s899_s1 + $0x18] sm:$0xff] (!%p248_p2)   ;;  %v729_v10 = vld [vmem:[%s902_s4 + $0x8] sm:$0xff] (!%p248_p2)  }
   0x8   : > { %667 = vmatpush3.bf16.msra.mxu0 (!%p248_p2), %v720_v1  ;;  %682 = vmatprep.mubr.msk.bf16.mxu0 (!%p248_p2), %vm745_vm0, %v744_v2  ;;  %v724_v11 = vld [vmem:[%s899_s1 + $0x20] sm:$0xff] (!%p248_p2)   ;;  %v730_v13 = vld [vmem:[%s902_s4 + $0x10] sm:$0xff] (!%p248_p2)   ;;  %v725_v14 = vld [vmem:[%s899_s1 + $0x28] sm:$0xff] (!%p248_p2)   ;;  %v293_v15 = vand.u32 (!%p248_p2), 127, %v292_v12 }
   0x9   : > { %668 = vmatprep.subr.bf16.mxu0 (!%p248_p2), %v744_v2  ;;  %702 = vmatprep.mubr.msk.bf16.mxu1 (!%p248_p2), %vm745_vm0, %v744_v2  ;;  %v731_v16 = vld [vmem:[%s902_s4 + $0x18] sm:$0xff] (!%p248_p2)   ;;  %v726_v17 = vld [vmem:[%s899_s1 + $0x30] sm:$0xff] (!%p248_p2)   ;;  %v732_v19 = vld [vmem:[%s902_s4 + $0x20] sm:$0xff] (!%p248_p2)  }
   0xa   : > { %719 = vset.pattern.permute.xlu0 (!%p248_p2), %v746_v5  ;;  %687 = vmatpush3.bf16.msra.mxu1 (!%p248_p2), %v728_v8  ;;  %vm295_vm1 = vcmp.lt.s32.totalorder (!%p248_p2), %v293_v15, 48  ;;  %v727_v20 = vld [vmem:[%s899_s1 + $0x38] sm:$0xff] (!%p248_p2)   ;;  %v733_v22 = vld [vmem:[%s902_s4 + $0x28] sm:$0xff] (!%p248_p2)   ;;  %v734_v24 = vld [vmem:[%s902_s4 + $0x30] sm:$0xff] (!%p248_p2)  }
   0xb   : > { %688 = vmatprep.subr.bf16.mxu1 (!%p248_p2), %v744_v2  ;;  %v735_v25 = vld [vmem:[%s902_s4 + $0x38] sm:$0xff] (!%p248_p2)   ;;  %v627_v27 = vld [vmem:[%s900_s2] ss:$0 sm:$0xff] (!%p248_p2) }
   0xc   : > { %669 = vmatpush3.bf16.msra.mxu0 (!%p248_p2), %v721_v3  ;;  %v636_v28 = vld [vmem:[%s901_s3] ss:$0 sm:$0xff] (!%p248_p2) }
   0xd   : > { %670 = vmatprep.subr.bf16.mxu0 (!%p248_p2), %v744_v2  ;;  %v637_v39 = vld [vmem:[%s903_s5] ss:$0 sm:$0xff] (!%p248_p2) }
   0xe   : > { %s908_s30 = smov (!%p280_p3, %s620_s30), 3  ;;  %689 = vmatpush3.bf16.msra.mxu1 %v729_v10 }
   0xf   : > { %s625_s15 = sshll.u32 %s908_s30, 3  ;;  %690 = vmatprep.subr.bf16.mxu1 %v744_v2  ;;  %s290_s19 = scalar_lea.vmem %s906_s8, %s908_s30 }
  0x10   : > { %s287_s18 = scalar_lea.vmem %s898_s0, %s625_s15  ;;  %671 = vmatpush3.bf16.msra.mxu0 %v722_v4  ;;  %s283_s13 = scalar_lea.vmem %s904_s6, %s625_s15 }
  0x11   : > { %v413_v6 = vld [vmem:[%s287_s18] sm:$0xff]  ;;  %672 = vmatprep.subr.bf16.mxu0 %v744_v2 }
  0x12   : > { %v414_v7 = vsub.f32 1.0, %v413_v6  ;;  %691 = vmatpush3.bf16.msra.mxu1 %v730_v13  ;;  %v291_v18 = vld [vmem:[%s283_s13] sm:$0xff] }
  0x13   : > { %692 = vmatprep.subr.bf16.mxu1 %v744_v2  ;;  %v296_v21 = vsel %vm295_vm1, %v291_v18, %v13_v0 }
  0x14   : > { %417 = vperm.xlu0 %719, %v414_v7   ;;  %673 = vmatpush3.bf16.msra.mxu0 %v723_v9  ;;  %v301_v23 = vpack.c.bf16 %v296_v21, %v296_v21 }
  0x15   : > { %674 = vmatprep.subr.bf16.mxu0 %v744_v2 }
  0x16   : > { %693 = vmatpush3.bf16.msra.mxu1 %v731_v16 }
  0x17   : > { %694 = vmatprep.subr.bf16.mxu1 %v744_v2 }
  0x18   : > { %430 = vperm.xlu0 %719, %v413_v6   ;;  %675 = vmatpush3.bf16.msra.mxu0 %v724_v11 }
  0x19   : > { %676 = vmatprep.subr.bf16.mxu0 %v744_v2 }
  0x1a   : > { %695 = vmatpush3.bf16.msra.mxu1 %v732_v19 }
  0x1b   : > { %696 = vmatprep.subr.bf16.mxu1 %v744_v2 }
  0x1c   : > { %677 = vmatpush3.bf16.msra.mxu0 %v725_v14 }
  0x1d   : > { %678 = vmatprep.subr.bf16.mxu0 %v744_v2 }
  0x1e   : > { %697 = vmatpush3.bf16.msra.mxu1 %v733_v22 }
  0x1f   : > { %698 = vmatprep.subr.bf16.mxu1 %v744_v2 }
  0x20   : > { %679 = vmatpush3.bf16.msra.mxu0 %v726_v17 }
  0x21   : > { %680 = vmatprep.subr.bf16.mxu0 %v744_v2 }
  0x22   : > { %699 = vmatpush3.bf16.msra.mxu1 %v734_v24 }
  0x23   : > { %700 = vmatprep.subr.bf16.mxu1 %v744_v2 }
  0x24   : > { %681 = vmatpush3.bf16.msra.mxu0 %v727_v20 }
  0x26   : > { %701 = vmatpush3.bf16.msra.mxu1 %v735_v25 }
  0x27   : > { %683 = vmatmul.mubr.bf16.vlgmr.msra.gmra.mrb[0].mxu0 %v301_v23 }
  0x93   : > { %v418_v26 = vpop.permute.xlu0 %417 }
  0x97   : > { %v431_v29 = vpop.permute.xlu0 %430 }
  0x98   : > { %v433_v34 = vmul.f32 %v636_v28, %v431_v29 }
  0xfa   : > { %v407_v30 = vpop.f32.mrb[0].mxu0 }
  0xfb   : > { %v408_v31 = vadd.f32 %v627_v27, %v407_v30  ;;  %v684_v32 = vpop.f32.mrb[1].mxu0 }
  0xfc   : > { %v410_v33 = vpop.f32.mrb[2].mxu0 }
  0xfd   : > { %v420_v35 = vmul.f32 %v418_v26, %v408_v31  ;;  %v685_v36 = vpop.f32.mrb[3].mxu0 }
  0xff   : > { %v434_v37 = vadd.f32 %v433_v34, %v420_v35 }
 0x101   : > { %v435_v38 = vpack.c.bf16 %v434_v37, %v434_v37 }
 0x103   : > { %703 = vmatmul.mubr.bf16.vlgmr.msra.gmra.mrb[0].mxu1 %v435_v38 }
 0x1d6   : > { %v541_v40 = vpop.f32.mrb[0].mxu1 }
 0x1d7   : > { %v542_v41 = vadd.f32 %v637_v39, %v541_v40  ;;  %v704_v42 = vpop.f32.mrb[1].mxu1 }
 0x1d8   : > { %v544_v43 = vpop.f32.mrb[2].mxu1 }
 0x1d9   : > { %v705_v44 = vpop.f32.mrb[3].mxu1  ;;  %v547_v45 = vsub.f32 %v296_v21, %v542_v41 }
 0x1db   : > { %v548_v46 = vand.u32 2147483647, %v547_v45 }
 0x1dd   : > { %v549_v47 = vmul.f32 %v548_v46, %v431_v29 }
 0x1df   : > { %550 = vadd.xlane.f32.xlu1 %v549_v47 }
 0x26c   : > { %v551_v48 = vpop.xlane.xlu1 %550 }
 0x26d   : > { %v552_v49 = vrot.slane %v551_v48, 4 }
 0x26f   : > { %v553_v50 = vadd.f32 %v552_v49, %v551_v48 }
 0x271   : > { %v554_v51 = vrot.slane %v553_v50, 2 }
 0x273   : > { %v555_v52 = vadd.f32 %v554_v51, %v553_v50 }
 0x275   : > { %v556_v53 = vrot.slane %v555_v52, 1 }
 0x277   : > { %v557_v54 = vadd.f32 %v556_v53, %v555_v52 }
 0x279   : > { %706 = vpush %v557_v54 }
 0x2aa   : > { %s707_s20 = spop %706 }
 0x2ab   : > { %v559_v55 = vstv %s707_s20 }
 0x2ac   : > { %560 = vst [vmem:[%s290_s19] sm:$0x1] %v559_v55 }
 0x2ad PF: > { %s19_s29 = sadd.s32 1, %s742_s29  }
 0x2ae   : > { %p16_p4 = scmp.ge.s32.totalorder %s19_s29, 6  }
 0x2b0   :  { %18 = sbr.rel (!%p16_p4) target bundleno = 2 (0x2), region = 81 }

</bundles_post_ra>
